<compile_context>
chip_gen: v6e
topology: v6e:2x2x1
jax: 0.10.0
libtpu: 0.0.40
codegen_flags: <defaults>
</compile_context>

<pallas_src>
import jax
import jax.numpy as jnp
from jax.experimental import pallas as pl
from jax.experimental.pallas import tpu as pltpu

H1, H2 = 128, 64  # hidden widths from the PyTorch module


def mlp_kernel(x_ref, w1_ref, b1_ref, w2_ref, b2_ref, w3_ref, b3_ref, o_ref):
    # x / weights are bf16; dots accumulate in f32 on the MXU.
    x = x_ref[...]                                                   # [TB, F] bf16
    h1 = jnp.dot(x, w1_ref[...], preferred_element_type=jnp.float32) + b1_ref[...]
    h1 = jnp.maximum(h1, 0.0)                                        # relu (f32)
    # dropout(p=0.5) -> identity at inference
    h2 = jnp.dot(h1.astype(jnp.bfloat16), w2_ref[...],
                 preferred_element_type=jnp.float32) + b2_ref[...]
    h2 = jnp.maximum(h2, 0.0)                                        # relu (f32)
    # dropout(p=0.5) -> identity at inference
    out = jnp.dot(h2.astype(jnp.bfloat16), w3_ref[...],
                  preferred_element_type=jnp.float32) + b3_ref[...]
    o_ref[...] = out.astype(o_ref.dtype)


def _round_up(a, m):
    return ((a + m - 1) // m) * m


def collision_classifier_mlp(x, params, *, max_tile_b=512):
    """x: [batch, input_size] f32. params: (in,out) weights and (1,out) biases."""
    batch, input_size = x.shape
    num_classes = params["w3"].shape[1]

    # Batch tile: large enough to amortize per-step overhead, multiple of 16
    # (bf16 sublane packing), capped so tiny demo batches don't over-pad much.
    tile_b = min(max_tile_b, _round_up(batch, 16))
    padded = _round_up(batch, tile_b)

    x_bf16 = x.astype(jnp.bfloat16)
    if padded != batch:
        x_bf16 = jnp.pad(x_bf16, ((0, padded - batch), (0, 0)))

    w1 = params["w1"].astype(jnp.bfloat16)
    w2 = params["w2"].astype(jnp.bfloat16)
    w3 = params["w3"].astype(jnp.bfloat16)
    b1 = params["b1"].astype(jnp.float32)
    b2 = params["b2"].astype(jnp.float32)
    b3 = params["b3"].astype(jnp.float32)

    def resident(arr):
        # Full-shape block, same block index on every grid step -> stays in VMEM.
        return pl.BlockSpec(arr.shape, lambda i: (0, 0))

    flops = 2 * padded * (input_size * H1 + H1 * H2 + H2 * num_classes)
    bytes_accessed = (
        padded * input_size * 2                                   # x read (bf16)
        + padded * num_classes * 4                                # out write (f32)
        + (input_size * H1 + H1 * H2 + H2 * num_classes) * 2     # weights (bf16)
        + (H1 + H2 + num_classes) * 4)                           # biases (f32)

    out = pl.pallas_call(
        mlp_kernel,
        out_shape=jax.ShapeDtypeStruct((padded, num_classes), jnp.float32),
        grid=(padded // tile_b,),
        in_specs=[
            pl.BlockSpec((tile_b, input_size), lambda i: (i, 0)),  # x: batch-tiled
            resident(w1), resident(b1),
            resident(w2), resident(b2),
            resident(w3), resident(b3),
        ],
        out_specs=pl.BlockSpec((tile_b, num_classes), lambda i: (i, 0)),
        compiler_params=pltpu.CompilerParams(
            dimension_semantics=("parallel",),       # shard batch across TCs on v7x
            vmem_limit_bytes=64 * 1024 * 1024,
        ),
        cost_estimate=pl.CostEstimate(
            flops=flops, transcendentals=0, bytes_accessed=bytes_accessed),
    )(x_bf16, w1, b1, w2, b2, w3, b3)

    return out[:batch]


def init_params(key, input_size, num_classes):
    """Deterministic synthetic init (PyTorch Linear-style uniform ranges)."""
    def linear_init(k, fan_in, fan_out):
        kw, kb = jax.random.split(k)
        bound = 1.0 / jnp.sqrt(float(fan_in))
        # stored already transposed to (in, out) for the kernel
        w = jax.random.uniform(kw, (fan_in, fan_out), jnp.float32, -bound, bound)
        b = jax.random.uniform(kb, (1, fan_out), jnp.float32, -bound, bound)
        return w, b

    k1, k2, k3 = jax.random.split(key, 3)
    w1, b1 = linear_init(k1, input_size, H1)
    w2, b2 = linear_init(k2, H1, H2)
    w3, b3 = linear_init(k3, H2, num_classes)
    return {"w1": w1, "b1": b1, "w2": w2, "b2": b2, "w3": w3, "b3": b3}


def reference_mlp(x, params):
    h1 = jnp.maximum(x @ params["w1"] + params["b1"], 0.0)
    h2 = jnp.maximum(h1 @ params["w2"] + params["b2"], 0.0)
    return h2 @ params["w3"] + params["b3"]


if __name__ == "__main__":
    # collision_type has 3 distinct labels -> num_classes = 3
    num_classes = 3
    # `fixed_features` is external in the reference; pick a small feature count.
    input_size = 32
    batch = 8

    key = jax.random.PRNGKey(0)
    kx, kp = jax.random.split(key)
    x = jax.random.normal(kx, (batch, input_size), jnp.float32)
    params = init_params(kp, input_size, num_classes)

    out = collision_classifier_mlp(x, params)
    out = jax.block_until_ready(out)

    ref = reference_mlp(x, params)
    assert out.shape == (batch, num_classes), out.shape
    # bf16 dot operands -> loosened tolerance vs the f32 reference.
    assert jnp.allclose(out, ref, atol=5e-2, rtol=5e-2), "mismatch vs JAX reference"

    print("KERNEL_OK")
</pallas_src>

<mosaic_0001>
module attributes {stable_mosaic.version = 11 : i64} {
  func.func @mlp_kernel(%arg0: i32, %arg1: memref<16x32xbf16, #tpu.memory_space<vmem>>, %arg2: memref<32x128xbf16, #tpu.memory_space<vmem>>, %arg3: memref<1x128xf32, #tpu.memory_space<vmem>>, %arg4: memref<128x64xbf16, #tpu.memory_space<vmem>>, %arg5: memref<1x64xf32, #tpu.memory_space<vmem>>, %arg6: memref<64x3xbf16, #tpu.memory_space<vmem>>, %arg7: memref<1x3xf32, #tpu.memory_space<vmem>>, %arg8: memref<16x3xf32, #tpu.memory_space<vmem>>) attributes {dimension_semantics = [#tpu.dimension_semantics<parallel>], iteration_bounds = array<i64: 1>, scalar_prefetch = 0 : i64, scratch_operands = 0 : i64, tpu.core_type = #tpu.core_type<tc>, window_params = [{transform_indices = @transform_0, window_bounds = array<i64: 16, 32>}, {pipeline_mode = #tpu.pipeline_mode<synchronous>, transform_indices = @transform_1, window_bounds = array<i64: 32, 128>}, {pipeline_mode = #tpu.pipeline_mode<synchronous>, transform_indices = @transform_2, window_bounds = array<i64: 1, 128>}, {pipeline_mode = #tpu.pipeline_mode<synchronous>, transform_indices = @transform_3, window_bounds = array<i64: 128, 64>}, {pipeline_mode = #tpu.pipeline_mode<synchronous>, transform_indices = @transform_4, window_bounds = array<i64: 1, 64>}, {pipeline_mode = #tpu.pipeline_mode<synchronous>, transform_indices = @transform_5, window_bounds = array<i64: 64, 3>}, {pipeline_mode = #tpu.pipeline_mode<synchronous>, transform_indices = @transform_6, window_bounds = array<i64: 1, 3>}, {transform_indices = @transform_7, window_bounds = array<i64: 16, 3>}]} {
    %c0 = arith.constant 0 : index
    %c0_0 = arith.constant 0 : index
    %0 = vector.load %arg1[%c0, %c0_0] : memref<16x32xbf16, #tpu.memory_space<vmem>>, vector<16x32xbf16>
    %c0_1 = arith.constant 0 : index
    %c0_2 = arith.constant 0 : index
    %1 = vector.load %arg2[%c0_1, %c0_2] : memref<32x128xbf16, #tpu.memory_space<vmem>>, vector<32x128xbf16>
    %cst = arith.constant dense<0.000000e+00> : vector<16x128xf32>
    %2 = tpu.matmul %0, %1, %cst {dimension_numbers = #tpu.dot_dimension_numbers<[1], [0], [0], [1], [0, 0, 1, 1], [], []>} : vector<16x32xbf16>, vector<32x128xbf16>, vector<16x128xf32> -> vector<16x128xf32>
    %c0_3 = arith.constant 0 : index
    %c0_4 = arith.constant 0 : index
    %3 = vector.load %arg3[%c0_3, %c0_4] : memref<1x128xf32, #tpu.memory_space<vmem>>, vector<1x128xf32>
    %4 = vector.broadcast %3 : vector<1x128xf32> to vector<16x128xf32>
    %5 = arith.addf %2, %4 : vector<16x128xf32>
    %cst_5 = arith.constant 0.000000e+00 : f32
    %6 = vector.broadcast %cst_5 : f32 to vector<16x128xf32>
    %7 = arith.maximumf %5, %6 : vector<16x128xf32>
    %8 = arith.truncf %7 : vector<16x128xf32> to vector<16x128xbf16>
    %c0_6 = arith.constant 0 : index
    %c0_7 = arith.constant 0 : index
    %9 = vector.load %arg4[%c0_6, %c0_7] : memref<128x64xbf16, #tpu.memory_space<vmem>>, vector<128x64xbf16>
    %cst_8 = arith.constant dense<0.000000e+00> : vector<16x64xf32>
    %10 = tpu.matmul %8, %9, %cst_8 {dimension_numbers = #tpu.dot_dimension_numbers<[1], [0], [0], [1], [0, 0, 1, 1], [], []>} : vector<16x128xbf16>, vector<128x64xbf16>, vector<16x64xf32> -> vector<16x64xf32>
    %c0_9 = arith.constant 0 : index
    %c0_10 = arith.constant 0 : index
    %11 = vector.load %arg5[%c0_9, %c0_10] : memref<1x64xf32, #tpu.memory_space<vmem>>, vector<1x64xf32>
    %12 = vector.broadcast %11 : vector<1x64xf32> to vector<16x64xf32>
    %13 = arith.addf %10, %12 : vector<16x64xf32>
    %cst_11 = arith.constant 0.000000e+00 : f32
    %14 = vector.broadcast %cst_11 : f32 to vector<16x64xf32>
    %15 = arith.maximumf %13, %14 : vector<16x64xf32>
    %16 = arith.truncf %15 : vector<16x64xf32> to vector<16x64xbf16>
    %c0_12 = arith.constant 0 : index
    %c0_13 = arith.constant 0 : index
    %17 = vector.load %arg6[%c0_12, %c0_13] : memref<64x3xbf16, #tpu.memory_space<vmem>>, vector<64x3xbf16>
    %cst_14 = arith.constant dense<0.000000e+00> : vector<16x3xf32>
    %18 = tpu.matmul %16, %17, %cst_14 {dimension_numbers = #tpu.dot_dimension_numbers<[1], [0], [0], [1], [0, 0, 1, 1], [], []>} : vector<16x64xbf16>, vector<64x3xbf16>, vector<16x3xf32> -> vector<16x3xf32>
    %c0_15 = arith.constant 0 : index
    %c0_16 = arith.constant 0 : index
    %19 = vector.load %arg7[%c0_15, %c0_16] : memref<1x3xf32, #tpu.memory_space<vmem>>, vector<1x3xf32>
    %20 = vector.broadcast %19 : vector<1x3xf32> to vector<16x3xf32>
    %21 = arith.addf %18, %20 : vector<16x3xf32>
    %c0_17 = arith.constant 0 : index
    %c0_18 = arith.constant 0 : index
    %22 = vector.load %arg8[%c0_17, %c0_18] : memref<16x3xf32, #tpu.memory_space<vmem>>, vector<16x3xf32>
    tpu.vector_store %arg8[%c0_17, %c0_18], %21 {strides = array<i32>} : memref<16x3xf32, #tpu.memory_space<vmem>>, vector<16x3xf32>,
    return
  }
  func.func @transform_0(%arg0: i32) -> (i32, i32) {
    %c0_i32 = arith.constant 0 : i32
    %c0_i32_0 = arith.constant 0 : i32
    return %arg0, %c0_i32 : i32, i32
  }
  func.func @transform_1(%arg0: i32) -> (i32, i32) {
    %c0_i32 = arith.constant 0 : i32
    %c0_i32_0 = arith.constant 0 : i32
    %c0_i32_1 = arith.constant 0 : i32
    return %c0_i32, %c0_i32_0 : i32, i32
  }
  func.func @transform_2(%arg0: i32) -> (i32, i32) {
    %c0_i32 = arith.constant 0 : i32
    %c0_i32_0 = arith.constant 0 : i32
    %c0_i32_1 = arith.constant 0 : i32
    return %c0_i32, %c0_i32_0 : i32, i32
  }
  func.func @transform_3(%arg0: i32) -> (i32, i32) {
    %c0_i32 = arith.constant 0 : i32
    %c0_i32_0 = arith.constant 0 : i32
    %c0_i32_1 = arith.constant 0 : i32
    return %c0_i32, %c0_i32_0 : i32, i32
  }
  func.func @transform_4(%arg0: i32) -> (i32, i32) {
    %c0_i32 = arith.constant 0 : i32
    %c0_i32_0 = arith.constant 0 : i32
    %c0_i32_1 = arith.constant 0 : i32
    return %c0_i32, %c0_i32_0 : i32, i32
  }
  func.func @transform_5(%arg0: i32) -> (i32, i32) {
    %c0_i32 = arith.constant 0 : i32
    %c0_i32_0 = arith.constant 0 : i32
    %c0_i32_1 = arith.constant 0 : i32
    return %c0_i32, %c0_i32_0 : i32, i32
  }
  func.func @transform_6(%arg0: i32) -> (i32, i32) {
    %c0_i32 = arith.constant 0 : i32
    %c0_i32_0 = arith.constant 0 : i32
    %c0_i32_1 = arith.constant 0 : i32
    return %c0_i32, %c0_i32_0 : i32, i32
  }
  func.func @transform_7(%arg0: i32) -> (i32, i32) {
    %c0_i32 = arith.constant 0 : i32
    %c0_i32_0 = arith.constant 0 : i32
    return %arg0, %c0_i32 : i32, i32
  }
}

</mosaic_0001>

<bundles_post_ra>
// kernel: tpu_custom_call.1
= control target key start
LH: loop header
LB: loop body
LE: loop exit
PB: predicated region body
PF: predicated region fallthrough
CT: control target
= control target key end

     0   :  { %v405_v0 = vmov 0.0   ;;  %vm406_vm0 = vmmov 0   ;;  %vm57_vm1 = vcmask 261120   ;;  %vm259_vm2 = vcmask 523264   ;;  %s510_s1 = inlined_call_operand.vmem [shape: bf16[32,128], index: 1, kind: input, shape index: {}]   ;;  %s511_s3 = inlined_call_operand.vmem [shape: bf16[128,64], index: 3, kind: input, shape index: {}]   ;;  %s512_s0 = inlined_call_operand.vmem [shape: bf16[16,32], index: 0, kind: input, shape index: {}]   ;;  %s513_s5 = inlined_call_operand.vmem [shape: bf16[64,3], index: 5, kind: input, shape index: {}]   ;;  %s514_s2 = inlined_call_operand.vmem [shape: f32[1,128], index: 2, kind: input, shape index: {}]   ;;  %s515_s4 = inlined_call_operand.vmem [shape: f32[1,64], index: 4, kind: input, shape index: {}]   ;;  %s516_s6 = inlined_call_operand.vmem [shape: f32[1,3], index: 6, kind: input, shape index: {}]   ;;  %s517_s7 = inlined_call_operand.vmem [shape: f32[16,3], index: 7, kind: output, shape index: {}]  }
   0x1   :  { %348 = vmatprep.subr.bf16.mxu0 %v405_v0  ;;  %v390_v1 = vld [vmem:[%s510_s1 + $0x8] sm:$0xff]   ;;  %352 = vmatprep.mubr.msk.bf16.mxu0 %vm406_vm0, %v405_v0  ;;  %v391_v2 = vld [vmem:[%s510_s1] sm:$0xff]   ;;  %v393_v3 = vld [vmem:[%s511_s3 + $0x38] sm:$0xff]   ;;  %vm304_vm3 = vcmask 23552  }
   0x2   :  { %356 = vmatprep.subr.bf16.mxu1 %v405_v0  ;;  %372 = vmatprep.mubr.msk.bf16.mxu1 %vm406_vm0, %v405_v0  ;;  %v392_v4 = vld [vmem:[%s512_s0] sm:$0xff]   ;;  %v394_v5 = vld [vmem:[%s511_s3 + $0x30] sm:$0xff]   ;;  %v395_v6 = vld [vmem:[%s511_s3 + $0x28] sm:$0xff]  }
   0x3   :  { %349 = vmatpush3.bf16.msra.mxu0 %v390_v1  ;;  %357 = vmatpush3.bf16.msra.mxu1 %v393_v3  ;;  %v396_v7 = vld [vmem:[%s511_s3 + $0x20] sm:$0xff]   ;;  %v397_v8 = vld [vmem:[%s511_s3 + $0x18] sm:$0xff]   ;;  %v398_v9 = vld [vmem:[%s511_s3 + $0x10] sm:$0xff]  }
   0x4   :  { %350 = vmatprep.subr.bf16.mxu0 %v405_v0  ;;  %358 = vmatprep.subr.bf16.mxu1 %v405_v0  ;;  %v399_v10 = vld [vmem:[%s511_s3 + $0x8] sm:$0xff]   ;;  %v400_v11 = vld [vmem:[%s511_s3] sm:$0xff]   ;;  %v401_v12 = vld [vmem:[%s513_s5 + $0x18] sm:$0xff]  }
   0x5   :  { %v311_v13 = vld [vmem:[%s514_s2] ss:$0 sm:$0xff]  ;;  %v402_v23 = vld [vmem:[%s513_s5 + $0x10] sm:$0xff]   ;;  %v403_v24 = vld [vmem:[%s513_s5 + $0x8] sm:$0xff]  }
   0x6   :  { %v404_v25 = vld [vmem:[%s513_s5] sm:$0xff]  }
   0x7   :  { %351 = vmatpush3.bf16.msra.mxu0 %v391_v2  ;;  %359 = vmatpush3.bf16.msra.mxu1 %v394_v5  ;;  %v316_v26 = vld [vmem:[%s515_s4] ss:$0 sm:$0xff] }
   0x8   :  { %376 = vmatprep.subr.bf16.mxu0 %v405_v0  ;;  %360 = vmatprep.subr.bf16.mxu1 %v405_v0  ;;  %v325_v36 = vld [vmem:[%s516_s6] ss:$0 sm:$0xff] }
   0xa   :  { %353 = vmatmul.mubr.msk.bf16.vlgmr.msra.gmra.mxu0 %vm57_vm1, %v392_v4 }
   0xb   :  { %384 = vmatprep.mubr.msk.bf16.mxu0 %vm406_vm0, %v405_v0  ;;  %361 = vmatpush3.bf16.msra.mxu1 %v395_v6 }
   0xc   :  { %362 = vmatprep.subr.bf16.mxu1 %v405_v0  ;;  %377 = vmatpush3.bf16.msra.mxu0 %v401_v12 }
   0xd   :  { %378 = vmatprep.subr.bf16.mxu0 %v405_v0 }
   0xf   :  { %363 = vmatpush3.bf16.msra.mxu1 %v396_v7 }
  0x10   :  { %364 = vmatprep.subr.bf16.mxu1 %v405_v0  ;;  %379 = vmatpush3.bf16.msra.mxu0 %v402_v23 }
  0x11   :  { %380 = vmatprep.subr.bf16.mxu0 %v405_v0 }
  0x13   :  { %365 = vmatpush3.bf16.msra.mxu1 %v397_v8 }
  0x14   :  { %366 = vmatprep.subr.bf16.mxu1 %v405_v0  ;;  %381 = vmatpush3.bf16.msra.mxu0 %v403_v24 }
  0x15   :  { %382 = vmatprep.subr.bf16.mxu0 %v405_v0 }
  0x17   :  { %367 = vmatpush3.bf16.msra.mxu1 %v398_v9 }
  0x18   :  { %368 = vmatprep.subr.bf16.mxu1 %v405_v0  ;;  %383 = vmatpush3.bf16.msra.mxu0 %v404_v25 }
  0x1b   :  { %369 = vmatpush3.bf16.msra.mxu1 %v399_v10 }
  0x1c   :  { %370 = vmatprep.subr.bf16.mxu1 %v405_v0 }
  0x1f   :  { %371 = vmatpush3.bf16.msra.mxu1 %v400_v11 }
  0xca   :  { %v95_v14 = vpop.f32.mrf.mxu0 }
  0xcb   :  { %v96_v16 = vadd.f32 %v311_v13, %v95_v14 }
  0xcc   :  { %v354_v15 = vpop.f32.mrf.mxu0 }
  0xcd   :  { %v102_v20 = vmax.f32 %v96_v16, 0.0 }
  0xce   :  { %v98_v17 = vpop.f32.mrf.mxu0 }
  0xcf   :  { %v99_v18 = vadd.f32 %v311_v13, %v98_v17 }
  0xd0   :  { %v355_v19 = vpop.f32.mrf.mxu0 }
  0xd1   :  { %v103_v21 = vmax.f32 %v99_v18, 0.0 }
  0xd3   :  { %v104_v22 = vpack.c.bf16 %v103_v21, %v102_v20 }
  0xd5   :  { %373 = vmatmul.mubr.bf16.vlgmr.msra.gmra.mxu1 %v104_v22 }
 0x195   :  { %v210_v27 = vpop.f32.mrf.mxu1 }
 0x196   :  { %v211_v29 = vadd.f32 %v316_v26, %v210_v27 }
 0x197   :  { %v374_v28 = vpop.f32.mrf.mxu1 }
 0x198   :  { %v217_v33 = vmax.f32 %v211_v29, 0.0 }
 0x199   :  { %v213_v30 = vpop.f32.mrf.mxu1 }
 0x19a   :  { %v214_v31 = vadd.f32 %v316_v26, %v213_v30 }
 0x19b   :  { %v375_v32 = vpop.f32.mrf.mxu1 }
 0x19c   :  { %v218_v34 = vmax.f32 %v214_v31, 0.0 }
 0x19e   :  { %v219_v35 = vpack.c.bf16 %v218_v34, %v217_v33 }
 0x1a0   :  { %385 = vmatmul.mubr.msk.bf16.vlgmr.msra.gmra.mxu0 %vm259_vm2, %v219_v35 }
 0x260   :  { %v297_v37 = vpop.f32.mrf.mxu0 }
 0x261   :  { %v298_v38 = vadd.f32 %v325_v36, %v297_v37 }
 0x262   :  { %v386_v39 = vpop.f32.mrf.mxu0 }
 0x263   :  { %305 = vst.msk [vmem:[%s517_s7] sm:$0xff] %vm304_vm3, %v298_v38 }
 0x264   :  { %v300_v40 = vpop.f32.mrf.mxu0 }
 0x265   :  { %v301_v41 = vadd.f32 %v325_v36, %v300_v40 }
 0x266   :  { %v387_v42 = vpop.f32.mrf.mxu0 }
 0x267   :  { %306 = vst.msk [vmem:[%s517_s7 + $0x8] sm:$0xff] %vm304_vm3, %v301_v41 }

</bundles_post_ra>
